<compile_context>
chip_gen: v7x
topology: tpu7x:2x2x1
jax: 0.10.0
libtpu: 0.0.40
codegen_flags: <defaults>
</compile_context>

<pallas_src>
import functools

import jax
import jax.numpy as jnp
from jax.experimental import pallas as pl
from jax.experimental.pallas import tpu as pltpu

_LANES = 128
_EPS = 1e-12


def _round_up(x, m):
    return ((x + m - 1) // m) * m


def _loss_kernel(*refs, scalar_margin, n_total, tile_rows, tiles_per_core,
                 n_row_blocks):
    if scalar_margin:
        m_smem, x1_ref, x2_ref, t_ref, out_ref = refs
    else:
        x1_ref, x2_ref, t_ref, m_ref, out_ref = refs

    p = pl.program_id(0)            # megacore-parallel chunk of row blocks
    t = pl.program_id(1)            # tile within the chunk (reduction axis)
    g = p * tiles_per_core + t      # global row-block index (may run past end)

    @pl.when(t == 0)
    def _init():
        out_ref[...] = jnp.zeros_like(out_ref)

    def tile_loss():
        x1 = x1_ref[...].astype(jnp.float32)
        x2 = x2_ref[...].astype(jnp.float32)
        tgt = t_ref[...].astype(jnp.float32)
        if scalar_margin:
            mg = m_smem[0] + _EPS          # scalar: computed once per step
        else:
            mg = m_ref[...].astype(jnp.float32) + _EPS
        inv_mg = 1.0 / mg
        half_mg = 0.5 * mg
        mul = -tgt * (x1 - x2)
        am = mul + mg
        quad = 0.5 * am * am * inv_mg
        # interval3 (mul<=0) -> mg/2 - mul ; interval2 (0<mul<mg) -> quad ; else 0
        return jnp.where(mul <= 0.0, half_mg - mul,
                         jnp.where(mul < mg, quad, 0.0))

    def accumulate(loss):
        # 128 lane-wise partial sums; cross-lane reduce happens in the wrapper.
        out_ref[...] += jnp.sum(loss, axis=0).reshape(1, 1, _LANES)

    @pl.when(g < n_row_blocks - 1)          # interior blocks: fully valid, no mask
    def _body():
        accumulate(tile_loss())

    @pl.when(g == n_row_blocks - 1)         # last block: mask padded / ragged tail
    def _tail():
        loss = tile_loss()
        row = jax.lax.broadcasted_iota(jnp.int32, (tile_rows, _LANES), 0)
        lane = jax.lax.broadcasted_iota(jnp.int32, (tile_rows, _LANES), 1)
        flat = (n_row_blocks - 1) * tile_rows * _LANES + row * _LANES + lane
        accumulate(jnp.where(flat < n_total, loss, 0.0))
    # Blocks with g >= n_row_blocks (only when chunks don't divide evenly) are
    # skipped entirely; their index_map is clamped so no OOB DMA is issued.


def margin_ranking_loss_smooth(input1, input2, target, margin, *,
                               max_tile_rows=4096, num_parallel=2):
    """Forward of MarginRankingLossSmooth.

    `input1`, `input2`, `target` share a shape; `margin` is either a scalar
    (fast path: SMEM scalar, 3 HBM streams) or a same-shape tensor (4 streams).
    Inputs are streamed in their native dtype (e.g. bf16) and cast in-kernel.
    """
    n_total = int(input1.size)
    scalar_margin = jnp.ndim(margin) == 0

    def as_lane_major(a):
        a = jnp.ravel(a)
        rem = n_total % _LANES
        if rem:                                   # only pad when reshape needs it
            a = jnp.pad(a, (0, _LANES - rem))
        return a.reshape(-1, _LANES)

    x1 = as_lane_major(input1)
    x2 = as_lane_major(input2)
    tgt = as_lane_major(target)
    rows = x1.shape[0]

    max_tile_rows = _round_up(max(int(max_tile_rows), 8), 8)
    tile_rows = min(max_tile_rows, _round_up(rows, 8))
    n_row_blocks = pl.cdiv(rows, tile_rows)
    num_parallel = max(1, min(int(num_parallel), n_row_blocks))
    tiles_per_core = pl.cdiv(n_row_blocks, num_parallel)
    grid = (num_parallel, tiles_per_core)

    def data_index_map(p, t, *_):
        # Clamp so the (rare) overhang tiles of the last chunk never DMA OOB;
        # the kernel skips their accumulation anyway.
        return (jnp.minimum(p * tiles_per_core + t, n_row_blocks - 1), 0)

    data_block = pl.BlockSpec((tile_rows, _LANES), data_index_map)
    out_spec = pl.BlockSpec((1, 1, _LANES), lambda p, t, *_: (p, 0, 0))

    if scalar_margin:
        margin_arr = jnp.asarray(margin, jnp.float32).reshape(1)
        operands = (margin_arr, x1, x2, tgt)
        in_specs = [data_block, data_block, data_block]
        num_prefetch = 1
        streams = (x1, x2, tgt)
    else:
        mg2d = as_lane_major(margin)
        operands = (x1, x2, tgt, mg2d)
        in_specs = [data_block, data_block, data_block, data_block]
        num_prefetch = 0
        streams = (x1, x2, tgt, mg2d)

    # Double-buffered input streams + slack; raised explicitly so big tiles fit
    # inside v5e's 16 MiB default scoped-VMEM limit.
    buf_bytes = sum(2 * tile_rows * _LANES * s.dtype.itemsize for s in streams)
    vmem_limit = int(buf_bytes) + (8 << 20)

    kernel = functools.partial(
        _loss_kernel, scalar_margin=scalar_margin, n_total=n_total,
        tile_rows=tile_rows, tiles_per_core=tiles_per_core,
        n_row_blocks=n_row_blocks)

    partial_sums = pl.pallas_call(
        kernel,
        out_shape=jax.ShapeDtypeStruct((num_parallel, 1, _LANES), jnp.float32),
        grid_spec=pltpu.PrefetchScalarGridSpec(
            num_scalar_prefetch=num_prefetch,
            grid=grid,
            in_specs=in_specs,
            out_specs=out_spec,
        ),
        compiler_params=pltpu.CompilerParams(
            dimension_semantics=("parallel", "arbitrary"),
            vmem_limit_bytes=vmem_limit,
        ),
    )(*operands)

    # Tiny finalize: sum num_parallel * 128 lane partials and divide by true N.
    return jnp.sum(partial_sums) / jnp.float32(n_total)


def margin_ranking_loss_smooth_reference(input1, input2, target, margin):
    """Pure-JAX reference mirroring the PyTorch forward exactly."""
    eps = 1e-12
    input1 = input1.astype(jnp.float32)
    input2 = input2.astype(jnp.float32)
    target = target.astype(jnp.float32)
    margin = jnp.asarray(margin, dtype=jnp.float32) + eps
    mul = -target * (input1 - input2)
    add_margin = mul + margin
    i1 = (mul >= margin).astype(jnp.float32)
    i2 = (mul < margin).astype(jnp.float32)
    i3 = (mul <= 0).astype(jnp.float32)
    i2 = i2 * (1.0 - i3)
    loss = i1 * 0.0 + i2 * 0.5 * add_margin ** 2 / margin + i3 * (margin / 2.0 - mul)
    return jnp.mean(loss)


if __name__ == "__main__":
    key = jax.random.PRNGKey(0)

    # (n, tensor_margin?, max_tile_rows, num_parallel)
    #  - 128 : single aligned block, scalar margin (fast path)
    #  - 77  : non-multiple-of-128 -> lane padding + tail mask
    #  - 2061: many tiles, ragged last block, both "cores", clamped overhang tile
    #  - 2000: per-element margin stream path, multi-block, parallel axis
    cases = [
        (128, False, 4096, 2),
        (77, False, 4096, 2),
        (2061, False, 8, 2),
        (2000, True, 8, 2),
    ]

    for n, tensor_margin, mtr, npar in cases:
        key, k1, k2, k3, k4 = jax.random.split(key, 5)
        input1 = jax.random.uniform(k1, (n,), dtype=jnp.float32)
        input2 = jax.random.uniform(k2, (n,), dtype=jnp.float32)
        target = jnp.sign(jax.random.normal(k3, (n,), dtype=jnp.float32))
        if tensor_margin:
            margin = jax.random.uniform(k4, (n,), dtype=jnp.float32) * 0.2
        else:
            margin = 0.05

        got = jax.block_until_ready(
            margin_ranking_loss_smooth(input1, input2, target, margin,
                                       max_tile_rows=mtr, num_parallel=npar))
        ref = jax.block_until_ready(
            margin_ranking_loss_smooth_reference(input1, input2, target, margin))

        assert jnp.isfinite(got), "kernel produced non-finite loss"
        assert jnp.allclose(got, ref, rtol=1e-5, atol=1e-6), (n, got, ref)

    print("KERNEL_OK")
</pallas_src>

<mosaic_0001>
module attributes {stable_mosaic.version = 11 : i64} {
  func.func @_loss_kernel(%arg0: i32, %arg1: i32, %arg2: memref<1xf32, #tpu.memory_space<smem>>, %arg3: memref<8x128xf32, #tpu.memory_space<vmem>>, %arg4: memref<8x128xf32, #tpu.memory_space<vmem>>, %arg5: memref<8x128xf32, #tpu.memory_space<vmem>>, %arg6: memref<1x1x128xf32, #tpu.memory_space<vmem>>) attributes {dimension_semantics = [#tpu.dimension_semantics<parallel>, #tpu.dimension_semantics<arbitrary>], iteration_bounds = array<i64: 1, 1>, scalar_prefetch = 1 : i64, scratch_operands = 0 : i64, tpu.core_type = #tpu.core_type<tc>, window_params = [{transform_indices = @transform_0, window_bounds = array<i64: 8, 128>}, {transform_indices = @transform_1, window_bounds = array<i64: 8, 128>}, {transform_indices = @transform_2, window_bounds = array<i64: 8, 128>}, {transform_indices = @transform_3, window_bounds = array<i64: 1, 1, 128>}]} {
    %c1_i32 = arith.constant 1 : i32
    %0 = arith.muli %arg0, %c1_i32 : i32
    %1 = arith.addi %0, %arg1 : i32
    %c0_i32 = arith.constant 0 : i32
    %2 = arith.cmpi eq, %arg1, %c0_i32 : i32
    %3 = arith.extui %2 : i1 to i32
    %c0_i32_0 = arith.constant 0 : i32
    %4 = arith.cmpi ne, %3, %c0_i32_0 : i32
    scf.if %4 {
      %cst = arith.constant 0.000000e+00 : f32
      %11 = vector.broadcast %cst : f32 to vector<1x1x128xf32>
      %c0 = arith.constant 0 : index
      %c0_5 = arith.constant 0 : index
      %c0_6 = arith.constant 0 : index
      %12 = vector.load %arg6[%c0, %c0_5, %c0_6] : memref<1x1x128xf32, #tpu.memory_space<vmem>>, vector<1x1x128xf32>
      tpu.vector_store %arg6[%c0, %c0_5, %c0_6], %11 {strides = array<i32>} : memref<1x1x128xf32, #tpu.memory_space<vmem>>, vector<1x1x128xf32>,
    } else {
    }
    %c0_i32_1 = arith.constant 0 : i32
    %5 = arith.cmpi slt, %1, %c0_i32_1 : i32
    %6 = arith.extui %5 : i1 to i32
    %c0_i32_2 = arith.constant 0 : i32
    %7 = arith.cmpi ne, %6, %c0_i32_2 : i32
    scf.if %7 {
      %c0 = arith.constant 0 : index
      %c0_5 = arith.constant 0 : index
      %11 = vector.load %arg3[%c0, %c0_5] : memref<8x128xf32, #tpu.memory_space<vmem>>, vector<8x128xf32>
      %c0_6 = arith.constant 0 : index
      %c0_7 = arith.constant 0 : index
      %12 = vector.load %arg4[%c0_6, %c0_7] : memref<8x128xf32, #tpu.memory_space<vmem>>, vector<8x128xf32>
      %c0_8 = arith.constant 0 : index
      %c0_9 = arith.constant 0 : index
      %13 = vector.load %arg5[%c0_8, %c0_9] : memref<8x128xf32, #tpu.memory_space<vmem>>, vector<8x128xf32>
      %c0_10 = arith.constant 0 : index
      %14 = memref.load %arg2[%c0_10] : memref<1xf32, #tpu.memory_space<smem>>
      %cst = arith.constant 9.99999996E-13 : f32
      %15 = arith.addf %14, %cst : f32
      %cst_11 = arith.constant 1.000000e+00 : f32
      %16 = arith.divf %cst_11, %15 : f32
      %cst_12 = arith.constant 5.000000e-01 : f32
      %17 = arith.mulf %cst_12, %15 : f32
      %cst_13 = arith.constant 0.000000e+00 : f32
      %18 = vector.broadcast %cst_13 : f32 to vector<8x128xf32>
      %19 = arith.subf %18, %13 : vector<8x128xf32>
      %20 = arith.subf %11, %12 : vector<8x128xf32>
      %21 = arith.mulf %19, %20 : vector<8x128xf32>
      %22 = vector.broadcast %15 : f32 to vector<8x128xf32>
      %23 = arith.addf %21, %22 : vector<8x128xf32>
      %cst_14 = arith.constant 5.000000e-01 : f32
      %24 = vector.broadcast %cst_14 : f32 to vector<8x128xf32>
      %25 = arith.mulf %24, %23 : vector<8x128xf32>
      %26 = arith.mulf %25, %23 : vector<8x128xf32>
      %27 = vector.broadcast %16 : f32 to vector<8x128xf32>
      %28 = arith.mulf %26, %27 : vector<8x128xf32>
      %cst_15 = arith.constant 0.000000e+00 : f32
      %29 = vector.broadcast %cst_15 : f32 to vector<8x128xf32>
      %30 = arith.cmpf ole, %21, %29 : vector<8x128xf32>
      %31 = vector.broadcast %17 : f32 to vector<8x128xf32>
      %32 = arith.subf %31, %21 : vector<8x128xf32>
      %33 = vector.broadcast %15 : f32 to vector<8x128xf32>
      %34 = arith.cmpf olt, %21, %33 : vector<8x128xf32>
      %cst_16 = arith.constant 0.000000e+00 : f32
      %35 = vector.broadcast %cst_16 : f32 to vector<8x128xf32>
      %36 = arith.select %34, %28, %35 : vector<8x128xi1>, vector<8x128xf32>
      %37 = arith.select %30, %32, %36 : vector<8x128xi1>, vector<8x128xf32>
      %c0_17 = arith.constant 0 : index
      %c0_18 = arith.constant 0 : index
      %c0_19 = arith.constant 0 : index
      %38 = vector.load %arg6[%c0_17, %c0_18, %c0_19] : memref<1x1x128xf32, #tpu.memory_space<vmem>>, vector<1x1x128xf32>
      %cst_20 = arith.constant dense<0.000000e+00> : vector<128xf32>
      %39 = vector.multi_reduction <add>, %37, %cst_20 [0] : vector<8x128xf32> to vector<128xf32>
      %40 = vector.shape_cast %39 : vector<128xf32> to vector<1x1x128xf32>
      %41 = arith.addf %38, %40 : vector<1x1x128xf32>
      %c0_21 = arith.constant 0 : index
      %c0_22 = arith.constant 0 : index
      %c0_23 = arith.constant 0 : index
      %42 = vector.load %arg6[%c0_21, %c0_22, %c0_23] : memref<1x1x128xf32, #tpu.memory_space<vmem>>, vector<1x1x128xf32>
      tpu.vector_store %arg6[%c0_21, %c0_22, %c0_23], %41 {strides = array<i32>} : memref<1x1x128xf32, #tpu.memory_space<vmem>>, vector<1x1x128xf32>,
    } else {
    }
    %c0_i32_3 = arith.constant 0 : i32
    %8 = arith.cmpi eq, %1, %c0_i32_3 : i32
    %9 = arith.extui %8 : i1 to i32
    %c0_i32_4 = arith.constant 0 : i32
    %10 = arith.cmpi ne, %9, %c0_i32_4 : i32
    scf.if %10 {
      %c0 = arith.constant 0 : index
      %c0_5 = arith.constant 0 : index
      %11 = vector.load %arg3[%c0, %c0_5] : memref<8x128xf32, #tpu.memory_space<vmem>>, vector<8x128xf32>
      %c0_6 = arith.constant 0 : index
      %c0_7 = arith.constant 0 : index
      %12 = vector.load %arg4[%c0_6, %c0_7] : memref<8x128xf32, #tpu.memory_space<vmem>>, vector<8x128xf32>
      %c0_8 = arith.constant 0 : index
      %c0_9 = arith.constant 0 : index
      %13 = vector.load %arg5[%c0_8, %c0_9] : memref<8x128xf32, #tpu.memory_space<vmem>>, vector<8x128xf32>
      %c0_10 = arith.constant 0 : index
      %14 = memref.load %arg2[%c0_10] : memref<1xf32, #tpu.memory_space<smem>>
      %cst = arith.constant 9.99999996E-13 : f32
      %15 = arith.addf %14, %cst : f32
      %cst_11 = arith.constant 1.000000e+00 : f32
      %16 = arith.divf %cst_11, %15 : f32
      %cst_12 = arith.constant 5.000000e-01 : f32
      %17 = arith.mulf %cst_12, %15 : f32
      %cst_13 = arith.constant 0.000000e+00 : f32
      %18 = vector.broadcast %cst_13 : f32 to vector<8x128xf32>
      %19 = arith.subf %18, %13 : vector<8x128xf32>
      %20 = arith.subf %11, %12 : vector<8x128xf32>
      %21 = arith.mulf %19, %20 : vector<8x128xf32>
      %22 = vector.broadcast %15 : f32 to vector<8x128xf32>
      %23 = arith.addf %21, %22 : vector<8x128xf32>
      %cst_14 = arith.constant 5.000000e-01 : f32
      %24 = vector.broadcast %cst_14 : f32 to vector<8x128xf32>
      %25 = arith.mulf %24, %23 : vector<8x128xf32>
      %26 = arith.mulf %25, %23 : vector<8x128xf32>
      %27 = vector.broadcast %16 : f32 to vector<8x128xf32>
      %28 = arith.mulf %26, %27 : vector<8x128xf32>
      %cst_15 = arith.constant 0.000000e+00 : f32
      %29 = vector.broadcast %cst_15 : f32 to vector<8x128xf32>
      %30 = arith.cmpf ole, %21, %29 : vector<8x128xf32>
      %31 = vector.broadcast %17 : f32 to vector<8x128xf32>
      %32 = arith.subf %31, %21 : vector<8x128xf32>
      %33 = vector.broadcast %15 : f32 to vector<8x128xf32>
      %34 = arith.cmpf olt, %21, %33 : vector<8x128xf32>
      %cst_16 = arith.constant 0.000000e+00 : f32
      %35 = vector.broadcast %cst_16 : f32 to vector<8x128xf32>
      %36 = arith.select %34, %28, %35 : vector<8x128xi1>, vector<8x128xf32>
      %37 = arith.select %30, %32, %36 : vector<8x128xi1>, vector<8x128xf32>
      %38 = tpu.iota {dimensions = array<i32: 0>} : vector<8x128xi32>
      %39 = tpu.iota {dimensions = array<i32: 1>} : vector<8x128xi32>
      %c128_i32 = arith.constant 128 : i32
      %40 = vector.broadcast %c128_i32 : i32 to vector<8x128xi32>
      %41 = arith.muli %38, %40 : vector<8x128xi32>
      %c0_i32_17 = arith.constant 0 : i32
      %42 = vector.broadcast %c0_i32_17 : i32 to vector<8x128xi32>
      %43 = arith.addi %42, %41 : vector<8x128xi32>
      %44 = arith.addi %43, %39 : vector<8x128xi32>
      %c128_i32_18 = arith.constant 128 : i32
      %45 = vector.broadcast %c128_i32_18 : i32 to vector<8x128xi32>
      %46 = arith.cmpi slt, %44, %45 : vector<8x128xi32>
      %cst_19 = arith.constant 0.000000e+00 : f32
      %47 = vector.broadcast %cst_19 : f32 to vector<8x128xf32>
      %48 = arith.select %46, %37, %47 : vector<8x128xi1>, vector<8x128xf32>
      %c0_20 = arith.constant 0 : index
      %c0_21 = arith.constant 0 : index
      %c0_22 = arith.constant 0 : index
      %49 = vector.load %arg6[%c0_20, %c0_21, %c0_22] : memref<1x1x128xf32, #tpu.memory_space<vmem>>, vector<1x1x128xf32>
      %cst_23 = arith.constant dense<0.000000e+00> : vector<128xf32>
      %50 = vector.multi_reduction <add>, %48, %cst_23 [0] : vector<8x128xf32> to vector<128xf32>
      %51 = vector.shape_cast %50 : vector<128xf32> to vector<1x1x128xf32>
      %52 = arith.addf %49, %51 : vector<1x1x128xf32>
      %c0_24 = arith.constant 0 : index
      %c0_25 = arith.constant 0 : index
      %c0_26 = arith.constant 0 : index
      %53 = vector.load %arg6[%c0_24, %c0_25, %c0_26] : memref<1x1x128xf32, #tpu.memory_space<vmem>>, vector<1x1x128xf32>
      tpu.vector_store %arg6[%c0_24, %c0_25, %c0_26], %52 {strides = array<i32>} : memref<1x1x128xf32, #tpu.memory_space<vmem>>, vector<1x1x128xf32>,
    } else {
    }
    return
  }
  func.func @transform_0(%arg0: i32, %arg1: i32, %arg2: memref<1xf32, #tpu.memory_space<smem>>) -> (i32, i32) {
    %c1_i32 = arith.constant 1 : i32
    %0 = arith.muli %arg0, %c1_i32 : i32
    %1 = arith.addi %0, %arg1 : i32
    %c0_i32 = arith.constant 0 : i32
    %2 = arith.minsi %1, %c0_i32 : i32
    %c0_i32_0 = arith.constant 0 : i32
    %c0_i32_1 = arith.constant 0 : i32
    return %2, %c0_i32_0 : i32, i32
  }
  func.func @transform_1(%arg0: i32, %arg1: i32, %arg2: memref<1xf32, #tpu.memory_space<smem>>) -> (i32, i32) {
    %c1_i32 = arith.constant 1 : i32
    %0 = arith.muli %arg0, %c1_i32 : i32
    %1 = arith.addi %0, %arg1 : i32
    %c0_i32 = arith.constant 0 : i32
    %2 = arith.minsi %1, %c0_i32 : i32
    %c0_i32_0 = arith.constant 0 : i32
    %c0_i32_1 = arith.constant 0 : i32
    return %2, %c0_i32_0 : i32, i32
  }
  func.func @transform_2(%arg0: i32, %arg1: i32, %arg2: memref<1xf32, #tpu.memory_space<smem>>) -> (i32, i32) {
    %c1_i32 = arith.constant 1 : i32
    %0 = arith.muli %arg0, %c1_i32 : i32
    %1 = arith.addi %0, %arg1 : i32
    %c0_i32 = arith.constant 0 : i32
    %2 = arith.minsi %1, %c0_i32 : i32
    %c0_i32_0 = arith.constant 0 : i32
    %c0_i32_1 = arith.constant 0 : i32
    return %2, %c0_i32_0 : i32, i32
  }
  func.func @transform_3(%arg0: i32, %arg1: i32, %arg2: memref<1xf32, #tpu.memory_space<smem>>) -> (i32, i32, i32) {
    %c0_i32 = arith.constant 0 : i32
    %c0_i32_0 = arith.constant 0 : i32
    %c0_i32_1 = arith.constant 0 : i32
    return %arg0, %c0_i32, %c0_i32_0 : i32, i32, i32
  }
}

</mosaic_0001>

<bundles_post_ra>
// kernel: tpu_custom_call.1
= control target key start
LH: loop header
LB: loop body
LE: loop exit
PB: predicated region body
PF: predicated region fallthrough
CT: control target
= control target key end

     0   :  { %s326_s0 = inlined_call_operand.<no memory space> [shape: f32[1], index: 0, kind: input, shape index: {}]   ;;  %s327_s1 = inlined_call_operand.vmem [shape: f32[1,128], index: 1, kind: input, shape index: {}]   ;;  %s328_s2 = inlined_call_operand.vmem [shape: f32[1,128], index: 2, kind: input, shape index: {}]   ;;  %s329_s3 = inlined_call_operand.vmem [shape: f32[1,128], index: 3, kind: input, shape index: {}]   ;;  %s330_s4 = inlined_call_operand.hbm [shape: f32[1,1,128], index: 4, kind: output, shape index: {}]  }
   0x1   :  { %s185_s17 = sadd.f32 1e-12, %s326_s0 }
   0x2   :  { %10 = vsyncpa [#allocation5], 0  ;;  %v275_v0 = vmov 0.0   ;;  %v181_v3 = vld [vmem:[%s327_s1] sm:$0xff]  ;;  %v205_v9 = vlaneseq }
   0x3   :  { %139 = vst [vmem:[#allocation4] sm:$0x1] %v275_v0  ;;  %v186_v1 = vstv %s185_s17  ;;  %v182_v4 = vld [vmem:[%s328_s2] sm:$0xff]  ;;  %s189_s0 = smul.f32 0.5, %s185_s17  ;;  %s276_s2 = smov [#allocation4]  }
   0x4   :  { %249 = vrcp.f32 %v186_v1  ;;  %v183_v5 = vld [vmem:[%s329_s3] sm:$0xff]  ;;  %v191_v7 = vsub.f32 %v181_v3, %v182_v4  ;;  %v206_v11 = vshrl.u32 %v205_v9, 7  ;;  %v208_v13 = vand.u32 127, %v205_v9  ;;  %s228_s3 = sshll.u32 %s276_s2, 4  ;;  %s229_s3 = int_to_ptr.vmem [resolvable:$true] %s228_s3 }
   0x5   :  { %v190_v6 = vsub.f32 0.0, %v183_v5  ;;  %v200_v15 = vstv %s189_s0  ;;  %s251_s24 = scalar_lea.vmem %s229_s3, 16  ;;  %s255_s25 = scalar_lea.vmem %s229_s3, 32 }
   0x6   :  { %v209_v14 = vmul.u32 128, %v206_v11  ;;  %p252_p0 = scmp.ne.s32.totalorder %s229_s3, %s251_s24  ;;  %p256_p1 = scmp.lt.s32.totalorder %s229_s3, %s229_s3 }
   0x7   :  { %v192_v8 = vmul.f32 %v191_v7, %v190_v6  ;;  %p257_p2 = scmp.lt.s32.totalorder %s255_s25, %s251_s24 }
   0x8   :  { %v210_v17 = vadd.s32 %v209_v14, %v208_v13 }
   0x9   :  { %v194_v10 = vadd.f32 %v192_v8, %v186_v1  ;;  %v201_v19 = vsub.f32 %v200_v15, %v192_v8  ;;  %vm202_vm0 = vcmp.lt.f32.partialorder %v192_v8, %v186_v1  ;;  %vm199_vm1 = vcmp.le.f32.partialorder %v192_v8, 0.0  ;;  %p258_p3 = por %p257_p2, %p256_p1 }
   0xa   :  { %vm211_vm2 = vcmp.lt.s32.totalorder %v210_v17, 128  ;;  %v213_v29 = vld [vmem:[#allocation4] sm:$0x1] }
   0xb   :  { %v195_v12 = vmul.f32 0.5, %v194_v10  ;;  %p259_p4 = pnand %p258_p3, %p252_p0 }
   0xd   :  { %v196_v16 = vmul.f32 %v195_v12, %v194_v10 }
   0xe   :  { %v250_v2 = vpop.eup %249 }
   0xf   :  { %245 = vpush %v250_v2 }
  0x40   :  { %s246_s1 = spop %245 }
  0x41   :  { %v197_v18 = vstv %s246_s1 }
  0x42   :  { %v198_v20 = vmul.f32 %v197_v18, %v196_v16 }
  0x44   :  { %v203_v21 = vsel %vm202_vm0, %v198_v20, 0.0 }
  0x45   :  { %v204_v22 = vsel %vm199_vm1, %v201_v19, %v203_v21 }
  0x46   :  { %v212_v23 = vsel %vm211_vm2, %v204_v22, 0.0 }
  0x47   :  { %v214_v24 = vrot.slane %v212_v23, 4 }
  0x49   :  { %v215_v25 = vadd.f32 %v214_v24, %v212_v23 }
  0x4b   :  { %v216_v26 = vrot.slane %v215_v25, 2 }
  0x4d   :  { %v217_v27 = vadd.f32 %v216_v26, %v215_v25 }
  0x4f   :  { %v218_v28 = vrot.slane %v217_v27, 1 }
  0x51   :  { %v219_v30 = vadd.f32 %v218_v28, %v217_v27 }
  0x53   :  { %v220_v31 = vadd.f32 %v219_v30, %v213_v29 }
  0x55   :  { %221 = vst [vmem:[#allocation4] sm:$0x1] %v220_v31 }
  0x56   :  { %262 = shalt.err (!%p259_p4)
}
  0x57   :  { %s263_s28 = scalar_lea.hbm %s330_s4, 16 }
  0x58   :  { %p264_p5 = scmp.ne.s32.totalorder %s330_s4, %s263_s28  ;;  %p267_p6 = scmp.lt.u32.totalorder %s263_s28, %s330_s4 }
  0x5a   :  { %p269_p7 = pnand %p267_p6, %p264_p5 }
  0x5c   :  { %272 = shalt.err (!%p269_p7)
}
  0x5d   :  { %231 = dma.vmem_to_hbm [thread:$0]  %s229_s3, 16, %s330_s4, [#allocation5]  }
  0x5e   :  { %273 = dma.done.wait [#allocation5], 16  }
  0x5f   :  { %274 = vsyncadd [#allocation5], 4294967280 }
  0x60   :  { %235 = vsyncpa [#allocation5], 1 }

</bundles_post_ra>
